<compile_context>
chip_gen: v7x
topology: tpu7x:2x2x1
jax: 0.10.0
libtpu: 0.0.40
codegen_flags: <defaults>
</compile_context>

<pallas_src>
import functools

import jax
import jax.numpy as jnp
from jax.experimental import pallas as pl
from jax.experimental.pallas import tpu as pltpu


def _round_up(x, m):
    return ((x + m - 1) // m) * m


def _apply_activation(x, activation):
    if activation == "relu":
        return jnp.maximum(x, 0.0)
    if activation == "elu":                       # nn.ELU(alpha=1.0)
        return jnp.where(x > 0.0, x, jnp.expm1(x))
    return x                                      # Identity


def _vmem_budget_bytes():
    """Generation-aware tile budget (target for the double-buffered footprint)."""
    cap = None
    try:
        cap = getattr(pltpu.get_tpu_info(), "vmem_capacity_bytes", None)
    except Exception:
        cap = None
    if not cap:
        cap = 64 << 20                            # conservative: v7x physical VMEM
    # ~3/8 of physical, capped: ~24 MiB on v5e/v6e (128 MiB) and on v7x (64 MiB).
    return int(min(int(cap) * 3 // 8, 24 << 20))


def _vmem_limit_bytes(footprint):
    """Explicit scoped-VMEM limit: generous margin over the planned footprint."""
    return int(min(max(footprint + (4 << 20), 16 << 20), 60 << 20))


def _prepare_params(weight, bias, F_pad, C_pad):
    """Transpose/pad/cast the Linear params; cache this outside hot loops."""
    C, F = weight.shape
    w_t = jnp.pad(weight.T.astype(jnp.bfloat16),
                  ((0, F_pad - F), (0, C_pad - C)))          # (F_pad, C_pad) bf16
    b2d = jnp.pad(bias.astype(jnp.float32).reshape(1, C),
                  ((0, 0), (0, C_pad - C)))                  # (1, C_pad) f32
    return w_t, b2d


# ---------------------------------------------------------------------------
# Path 1 (default): fused BN + matmul, batch un-tiled, class axis un-gridded.
# ---------------------------------------------------------------------------
def _plan_fused(B, F, C, x_bytes, budget):
    C_pad = _round_up(C, 128)
    fixed = B * C_pad * 4 + 2 * C_pad * 4 + (64 << 10)   # resident f32 out + bias + slack
    per_tf = 2 * B * x_bytes + 2 * C_pad * 2             # dbl-buffered x + bf16 w, per feature
    avail = budget - fixed
    if avail < 128 * per_tf:
        return None                                       # doesn't fit -> two-pass path
    tf = min(_round_up(F, 128), 1024, (avail // per_tf) // 128 * 128)
    F_pad = _round_up(F, tf)
    return dict(tf=tf, F_pad=F_pad, C_pad=C_pad, footprint=fixed + tf * per_tf)


def _fused_kernel(x_ref, w_ref, b_ref, o_ref, *, activation, eps):
    k = pl.program_id(0)                                  # feature reduction axis

    @pl.when(k == 0)
    def _init():
        o_ref[...] = jnp.zeros_like(o_ref)

    x = x_ref[...].astype(jnp.float32)                    # (B, tf), full batch
    x = _apply_activation(x, activation)

    # BatchNorm1d training-mode statistics over the (un-tiled) batch axis.
    mean = jnp.mean(x, axis=0, keepdims=True)             # (1, tf)
    xc = x - mean                                         # hoisted, reused below
    var = jnp.mean(xc * xc, axis=0, keepdims=True)        # biased variance
    xn = xc * jax.lax.rsqrt(var + eps)                    # (B, tf)

    # bf16 operands into the MXU, f32 accumulation directly into the output.
    o_ref[...] += jnp.dot(xn.astype(jnp.bfloat16), w_ref[...],
                          preferred_element_type=jnp.float32)

    @pl.when(k == pl.num_programs(0) - 1)
    def _finalize():
        o_ref[...] += b_ref[...]


def _run_fused(x, weight, bias, activation, eps, plan):
    B, F = x.shape
    C = weight.shape[0]
    tf, F_pad, C_pad = plan["tf"], plan["F_pad"], plan["C_pad"]
    vlimit = _vmem_limit_bytes(plan["footprint"])

    x_p = x if F_pad == F else jnp.pad(x, ((0, 0), (0, F_pad - F)))
    w_p, b_p = _prepare_params(weight, bias, F_pad, C_pad)

    kernel = functools.partial(_fused_kernel, activation=activation, eps=eps)
    out = pl.pallas_call(
        kernel,
        out_shape=jax.ShapeDtypeStruct((B, C_pad), jnp.float32),
        grid_spec=pltpu.PrefetchScalarGridSpec(
            num_scalar_prefetch=0,
            grid=(F_pad // tf,),                            # feature reduction only
            in_specs=[
                pl.BlockSpec((B, tf), lambda k: (0, k)),        # activations (read once)
                pl.BlockSpec((tf, C_pad), lambda k: (k, 0)),    # bf16 weight
                pl.BlockSpec((1, C_pad), lambda k: (0, 0)),     # bias
            ],
            out_specs=pl.BlockSpec((B, C_pad), lambda k: (0, 0)),  # resident accumulator
        ),
        compiler_params=pltpu.CompilerParams(
            dimension_semantics=("arbitrary",),
            vmem_limit_bytes=vlimit),
    )(x_p, w_p, b_p)
    return out[:, :C]


# ---------------------------------------------------------------------------
# Path 2 (fallback for large B / large C): two-pass BN stats + tiled matmul.
# ---------------------------------------------------------------------------
def _plan_two_pass(B, F, C, x_bytes, budget):
    C_pad = _round_up(C, 128)
    tb = min(_round_up(B, 8), 512)
    tf = min(_round_up(F, 128), 512)

    def footprint(tb_, tf_):
        return (2 * tb_ * tf_ * x_bytes       # double-buffered x tile
                + 2 * tf_ * C_pad * 2         # double-buffered bf16 weight tile
                + 2 * tb_ * C_pad * 4         # double-buffered f32 output tile
                + 2 * 2 * tf_ * 4             # mean/rstd tile
                + 2 * C_pad * 4               # bias
                + (64 << 10))                 # slack

    while tf > 128 and footprint(tb, tf) > budget:
        tf -= 128
    while tb > 8 and footprint(tb, tf) > budget:
        tb = max(8, (tb // 2) // 8 * 8)
    # TODO(synk): if footprint(8, 128) still exceeds the budget (extremely large
    # num_classes) the class axis would also need tiling; not needed for
    # typical classification heads.
    return tb, tf, C_pad, footprint(tb, tf)


def _stats_kernel(x_ref, sum_ref, ssq_ref, *, activation):
    b = pl.program_id(1)                                  # batch reduction axis (last)

    @pl.when(b == 0)
    def _init():
        sum_ref[...] = jnp.zeros_like(sum_ref)
        ssq_ref[...] = jnp.zeros_like(ssq_ref)

    x = x_ref[...].astype(jnp.float32)
    x = _apply_activation(x, activation)
    sum_ref[...] += jnp.sum(x, axis=0, keepdims=True)
    ssq_ref[...] += jnp.sum(x * x, axis=0, keepdims=True)


def _norm_matmul_kernel(x_ref, w_ref, b_ref, stats_ref, o_ref, *, activation):
    k = pl.program_id(1)                                  # feature reduction axis (last)

    @pl.when(k == 0)
    def _init():
        o_ref[...] = jnp.zeros_like(o_ref)

    x = x_ref[...].astype(jnp.float32)
    x = _apply_activation(x, activation)
    st = stats_ref[...]                                    # (2, tf): [mean; rstd]
    xn = (x - st[0:1, :]) * st[1:2, :]
    o_ref[...] += jnp.dot(xn.astype(jnp.bfloat16), w_ref[...],
                          preferred_element_type=jnp.float32)

    @pl.when(k == pl.num_programs(1) - 1)
    def _finalize():
        o_ref[...] += b_ref[...]


def _run_two_pass(x, weight, bias, activation, eps, budget):
    B, F = x.shape
    C = weight.shape[0]
    x_bytes = jnp.dtype(x.dtype).itemsize
    tb, tf, C_pad, footprint = _plan_two_pass(B, F, C, x_bytes, budget)
    B_pad = _round_up(B, tb)
    F_pad = _round_up(F, tf)
    vlimit = _vmem_limit_bytes(footprint)

    x_p = x
    if (B_pad, F_pad) != (B, F):
        x_p = jnp.pad(x, ((0, B_pad - B), (0, F_pad - F)))
    w_p, b_p = _prepare_params(weight, bias, F_pad, C_pad)

    # Pass 1: per-feature sum / sum-of-squares reduced over batch tiles.
    stats_kernel = functools.partial(_stats_kernel, activation=activation)
    xsum, xssq = pl.pallas_call(
        stats_kernel,
        out_shape=(jax.ShapeDtypeStruct((1, F_pad), jnp.float32),
                   jax.ShapeDtypeStruct((1, F_pad), jnp.float32)),
        grid_spec=pltpu.PrefetchScalarGridSpec(
            num_scalar_prefetch=0,
            grid=(F_pad // tf, B_pad // tb),              # batch (reduction) last
            in_specs=[pl.BlockSpec((tb, tf), lambda f, b: (b, f))],
            out_specs=[pl.BlockSpec((1, tf), lambda f, b: (0, f)),
                       pl.BlockSpec((1, tf), lambda f, b: (0, f))],
        ),
        compiler_params=pltpu.CompilerParams(
            dimension_semantics=("parallel", "arbitrary"),
            vmem_limit_bytes=vlimit),
    )(x_p)

    # Zero-padded batch rows contribute act(0)=0 to both sums, so dividing by
    # the true B keeps the training-mode statistics exact.
    mean = xsum / B
    var = jnp.maximum(xssq / B - mean * mean, 0.0)        # biased variance
    rstd = jax.lax.rsqrt(var + eps)
    stats = jnp.concatenate([mean, rstd], axis=0)         # (2, F_pad) f32

    # Pass 2: normalize + matmul with the batch axis tiled (megacore-parallel).
    nm_kernel = functools.partial(_norm_matmul_kernel, activation=activation)
    out = pl.pallas_call(
        nm_kernel,
        out_shape=jax.ShapeDtypeStruct((B_pad, C_pad), jnp.float32),
        grid_spec=pltpu.PrefetchScalarGridSpec(
            num_scalar_prefetch=0,
            grid=(B_pad // tb, F_pad // tf),              # feature (reduction) last
            in_specs=[
                pl.BlockSpec((tb, tf), lambda i, k: (i, k)),      # activations
                pl.BlockSpec((tf, C_pad), lambda i, k: (k, 0)),   # bf16 weight
                pl.BlockSpec((1, C_pad), lambda i, k: (0, 0)),    # bias
                pl.BlockSpec((2, tf), lambda i, k: (0, k)),       # mean / rstd
            ],
            out_specs=pl.BlockSpec((tb, C_pad), lambda i, k: (i, 0)),
        ),
        compiler_params=pltpu.CompilerParams(
            dimension_semantics=("parallel", "arbitrary"),
            vmem_limit_bytes=vlimit),
    )(x_p, w_p, b_p, stats)
    return out[:B, :C]


# ---------------------------------------------------------------------------
# Public wrapper.
# ---------------------------------------------------------------------------
def batchnorm_linear_head(x, weight, bias, activation=None, eps=1e-6,
                          force_two_pass=False):
    """x: (B, F); weight: (C, F) as in nn.Linear; bias: (C,). Returns f32 (B, C)."""
    B, F = x.shape
    C = weight.shape[0]
    x_bytes = jnp.dtype(x.dtype).itemsize                 # bf16 x halves HBM reads
    budget = _vmem_budget_bytes()
    plan = None if force_two_pass else _plan_fused(B, F, C, x_bytes, budget)
    if plan is not None:
        return _run_fused(x, weight, bias, activation, eps, plan)
    return _run_two_pass(x, weight, bias, activation, eps, budget)


def _reference(x, weight, bias, activation, eps=1e-6):
    """Pure-JAX reference with matching bf16-operand / f32-accumulate matmul."""
    xf = x.astype(jnp.float32)
    if activation == "relu":
        xf = jnp.maximum(xf, 0.0)
    elif activation == "elu":
        xf = jnp.where(xf > 0.0, xf, jnp.expm1(xf))
    mu = jnp.mean(xf, axis=0, keepdims=True)
    var = jnp.mean((xf - mu) ** 2, axis=0, keepdims=True)
    xn = (xf - mu) * jax.lax.rsqrt(var + eps)
    out = jnp.dot(xn.astype(jnp.bfloat16), weight.T.astype(jnp.bfloat16),
                  preferred_element_type=jnp.float32) + bias.astype(jnp.float32)
    return out


if __name__ == "__main__":
    # Small shapes consistent with the module: x of (batch, in_features).
    B, F, C = 8, 32, 10

    key = jax.random.PRNGKey(0)
    kx, kw, kb = jax.random.split(key, 3)
    x = jax.random.normal(kx, (B, F), dtype=jnp.float32)
    # nn.Linear-style params: weight (C, F), bias (C,)
    bound = 1.0 / (F ** 0.5)
    weight = jax.random.uniform(kw, (C, F), minval=-bound, maxval=bound,
                                dtype=jnp.float32)
    bias = jax.random.uniform(kb, (C,), minval=-bound, maxval=bound,
                              dtype=jnp.float32)

    for activation in ("relu", "elu", None):
        ref = _reference(x, weight, bias, activation)
        for force_two_pass in (False, True):
            out = batchnorm_linear_head(x, weight, bias, activation=activation,
                                        force_two_pass=force_two_pass)
            jax.block_until_ready(out)
            assert out.shape == (B, C)
            assert jnp.allclose(out, ref, atol=2e-3, rtol=2e-3), (
                f"mismatch (activation={activation}, two_pass={force_two_pass}): "
                f"max_abs_err={float(jnp.max(jnp.abs(out - ref)))}")

    print("KERNEL_OK")
</pallas_src>

<mosaic_0001>
module attributes {stable_mosaic.version = 11 : i64} {
  func.func @_fused_kernel(%arg0: i32, %arg1: memref<8x128xf32, #tpu.memory_space<vmem>>, %arg2: memref<128x128xbf16, #tpu.memory_space<vmem>>, %arg3: memref<1x128xf32, #tpu.memory_space<vmem>>, %arg4: memref<8x128xf32, #tpu.memory_space<vmem>>) attributes {dimension_semantics = [#tpu.dimension_semantics<arbitrary>], iteration_bounds = array<i64: 1>, scalar_prefetch = 0 : i64, scratch_operands = 0 : i64, tpu.core_type = #tpu.core_type<tc>, window_params = [{transform_indices = @transform_0, window_bounds = array<i64: 8, 128>}, {transform_indices = @transform_1, window_bounds = array<i64: 128, 128>}, {pipeline_mode = #tpu.pipeline_mode<synchronous>, transform_indices = @transform_2, window_bounds = array<i64: 1, 128>}, {pipeline_mode = #tpu.pipeline_mode<synchronous>, transform_indices = @transform_3, window_bounds = array<i64: 8, 128>}]} {
    %c0_i32 = arith.constant 0 : i32
    %0 = arith.cmpi eq, %arg0, %c0_i32 : i32
    %1 = arith.extui %0 : i1 to i32
    %c0_i32_0 = arith.constant 0 : i32
    %2 = arith.cmpi ne, %1, %c0_i32_0 : i32
    scf.if %2 {
      %cst_16 = arith.constant 0.000000e+00 : f32
      %31 = vector.broadcast %cst_16 : f32 to vector<8x128xf32>
      %c0_17 = arith.constant 0 : index
      %c0_18 = arith.constant 0 : index
      %32 = vector.load %arg4[%c0_17, %c0_18] : memref<8x128xf32, #tpu.memory_space<vmem>>, vector<8x128xf32>
      tpu.vector_store %arg4[%c0_17, %c0_18], %31 {strides = array<i32>} : memref<8x128xf32, #tpu.memory_space<vmem>>, vector<8x128xf32>,
    } else {
    }
    %c0 = arith.constant 0 : index
    %c0_1 = arith.constant 0 : index
    %3 = vector.load %arg1[%c0, %c0_1] : memref<8x128xf32, #tpu.memory_space<vmem>>, vector<8x128xf32>
    %cst = arith.constant 0.000000e+00 : f32
    %4 = vector.broadcast %cst : f32 to vector<8x128xf32>
    %5 = arith.maximumf %3, %4 : vector<8x128xf32>
    %cst_2 = arith.constant dense<0.000000e+00> : vector<128xf32>
    %6 = vector.multi_reduction <add>, %5, %cst_2 [0] : vector<8x128xf32> to vector<128xf32>
    %7 = vector.shape_cast %6 : vector<128xf32> to vector<1x128xf32>
    %cst_3 = arith.constant 8.000000e+00 : f32
    %8 = vector.broadcast %cst_3 : f32 to vector<1x128xf32>
    %9 = arith.divf %7, %8 : vector<1x128xf32>
    %10 = vector.broadcast %9 : vector<1x128xf32> to vector<8x128xf32>
    %11 = arith.subf %5, %10 : vector<8x128xf32>
    %12 = arith.mulf %11, %11 : vector<8x128xf32>
    %cst_4 = arith.constant dense<0.000000e+00> : vector<128xf32>
    %13 = vector.multi_reduction <add>, %12, %cst_4 [0] : vector<8x128xf32> to vector<128xf32>
    %14 = vector.shape_cast %13 : vector<128xf32> to vector<1x128xf32>
    %cst_5 = arith.constant 8.000000e+00 : f32
    %15 = vector.broadcast %cst_5 : f32 to vector<1x128xf32>
    %16 = arith.divf %14, %15 : vector<1x128xf32>
    %cst_6 = arith.constant 9.99999997E-7 : f32
    %17 = vector.broadcast %cst_6 : f32 to vector<1x128xf32>
    %18 = arith.addf %16, %17 : vector<1x128xf32>
    %19 = math.rsqrt %18 : vector<1x128xf32>
    %20 = vector.broadcast %19 : vector<1x128xf32> to vector<8x128xf32>
    %21 = arith.mulf %11, %20 : vector<8x128xf32>
    %c0_7 = arith.constant 0 : index
    %c0_8 = arith.constant 0 : index
    %22 = vector.load %arg4[%c0_7, %c0_8] : memref<8x128xf32, #tpu.memory_space<vmem>>, vector<8x128xf32>
    %23 = arith.truncf %21 : vector<8x128xf32> to vector<8x128xbf16>
    %c0_9 = arith.constant 0 : index
    %c0_10 = arith.constant 0 : index
    %24 = vector.load %arg2[%c0_9, %c0_10] : memref<128x128xbf16, #tpu.memory_space<vmem>>, vector<128x128xbf16>
    %cst_11 = arith.constant dense<0.000000e+00> : vector<8x128xf32>
    %25 = tpu.matmul %23, %24, %cst_11 {dimension_numbers = #tpu.dot_dimension_numbers<[1], [0], [0], [1], [0, 0, 1, 1], [], []>} : vector<8x128xbf16>, vector<128x128xbf16>, vector<8x128xf32> -> vector<8x128xf32>
    %26 = arith.addf %22, %25 : vector<8x128xf32>
    %c0_12 = arith.constant 0 : index
    %c0_13 = arith.constant 0 : index
    %27 = vector.load %arg4[%c0_12, %c0_13] : memref<8x128xf32, #tpu.memory_space<vmem>>, vector<8x128xf32>
    tpu.vector_store %arg4[%c0_12, %c0_13], %26 {strides = array<i32>} : memref<8x128xf32, #tpu.memory_space<vmem>>, vector<8x128xf32>,
    %c0_i32_14 = arith.constant 0 : i32
    %28 = arith.cmpi eq, %arg0, %c0_i32_14 : i32
    %29 = arith.extui %28 : i1 to i32
    %c0_i32_15 = arith.constant 0 : i32
    %30 = arith.cmpi ne, %29, %c0_i32_15 : i32
    scf.if %30 {
      %c0_16 = arith.constant 0 : index
      %c0_17 = arith.constant 0 : index
      %31 = vector.load %arg4[%c0_16, %c0_17] : memref<8x128xf32, #tpu.memory_space<vmem>>, vector<8x128xf32>
      %c0_18 = arith.constant 0 : index
      %c0_19 = arith.constant 0 : index
      %32 = vector.load %arg3[%c0_18, %c0_19] : memref<1x128xf32, #tpu.memory_space<vmem>>, vector<1x128xf32>
      %33 = vector.broadcast %32 : vector<1x128xf32> to vector<8x128xf32>
      %34 = arith.addf %31, %33 : vector<8x128xf32>
      %c0_20 = arith.constant 0 : index
      %c0_21 = arith.constant 0 : index
      %35 = vector.load %arg4[%c0_20, %c0_21] : memref<8x128xf32, #tpu.memory_space<vmem>>, vector<8x128xf32>
      tpu.vector_store %arg4[%c0_20, %c0_21], %34 {strides = array<i32>} : memref<8x128xf32, #tpu.memory_space<vmem>>, vector<8x128xf32>,
    } else {
    }
    return
  }
  func.func @transform_0(%arg0: i32) -> (i32, i32) {
    %c0_i32 = arith.constant 0 : i32
    %c0_i32_0 = arith.constant 0 : i32
    return %c0_i32, %arg0 : i32, i32
  }
  func.func @transform_1(%arg0: i32) -> (i32, i32) {
    %c0_i32 = arith.constant 0 : i32
    %c0_i32_0 = arith.constant 0 : i32
    return %arg0, %c0_i32 : i32, i32
  }
  func.func @transform_2(%arg0: i32) -> (i32, i32) {
    %c0_i32 = arith.constant 0 : i32
    %c0_i32_0 = arith.constant 0 : i32
    %c0_i32_1 = arith.constant 0 : i32
    return %c0_i32, %c0_i32_0 : i32, i32
  }
  func.func @transform_3(%arg0: i32) -> (i32, i32) {
    %c0_i32 = arith.constant 0 : i32
    %c0_i32_0 = arith.constant 0 : i32
    %c0_i32_1 = arith.constant 0 : i32
    return %c0_i32, %c0_i32_0 : i32, i32
  }
}

</mosaic_0001>

<bundles_post_ra>
// kernel: tpu_custom_call.1
= control target key start
LH: loop header
LB: loop body
LE: loop exit
PB: predicated region body
PF: predicated region fallthrough
CT: control target
= control target key end

     0   :  { %8 = vsyncpa [#allocation3], 0  ;;  %s406_s0 = inlined_call_operand.hbm [shape: f32[8,128], index: 0, kind: input, shape index: {}]   ;;  %s407_s1 = inlined_call_operand.hbm [shape: bf16[128,128], index: 1, kind: input, shape index: {}]   ;;  %s408_s2 = inlined_call_operand.vmem [shape: f32[1,128], index: 2, kind: input, shape index: {}]   ;;  %s409_s3 = inlined_call_operand.hbm [shape: f32[8,128], index: 3, kind: output, shape index: {}]  }
   0x1   :  { %9 = vsyncpa [#allocation6], 0 }
   0x2   :  { %10 = vsyncpa [#allocation4], 0  ;;  %s333_s12 = smov [#allocation2]   ;;  %s334_s14 = smov [#allocation5]  }
   0x3   :  { %s17_s13 = sshll.u32 %s333_s12, 4  ;;  %s26_s15 = sshll.u32 %s334_s14, 4  ;;  %s18_s13 = int_to_ptr.vmem [resolvable:$true] %s17_s13  ;;  %s360_s15 = int_to_ptr.vmem [resolvable:$true] %s26_s15 }
   0x4   :  { %s261_s18 = scalar_lea.hbm %s406_s0, 128 }
   0x5   :  { %p262_p0 = scmp.ne.s32.totalorder %s406_s0, %s261_s18  ;;  %p265_p1 = scmp.lt.u32.totalorder %s261_s18, %s406_s0 }
   0x7   :  { %p267_p2 = pnand %p265_p1, %p262_p0 }
   0x9   :  { %270 = shalt.err (!%p267_p2)
}
   0xa   :  { %s271_s23 = scalar_lea.vmem %s18_s13, 128  ;;  %p276_p4 = scmp.lt.s32.totalorder %s18_s13, %s18_s13 }
   0xb   :  { %p272_p3 = scmp.ne.s32.totalorder %s18_s13, %s271_s23  ;;  %p277_p5 = scmp.lt.s32.totalorder %s271_s23, %s271_s23 }
   0xd   :  { %p278_p6 = por %p277_p5, %p276_p4 }
   0xf   :  { %p279_p7 = pnand %p278_p6, %p272_p3 }
  0x11   :  { %282 = shalt.err (!%p279_p7)
}
  0x12   :  { %20 = dma.hbm_to_vmem [thread:$0]  %s406_s0, 128, %s18_s13, [#allocation3]  }
  0x13   :  { %s283_s28 = scalar_lea.hbm %s407_s1, 1024 }
  0x14   :  { %p284_p8 = scmp.ne.s32.totalorder %s407_s1, %s283_s28  ;;  %p287_p9 = scmp.lt.u32.totalorder %s283_s28, %s407_s1 }
  0x16   :  { %p289_p10 = pnand %p287_p9, %p284_p8 }
  0x18   :  { %292 = shalt.err (!%p289_p10)
}
  0x19   :  { %s293_s6 = scalar_lea.vmem %s360_s15, 1024  ;;  %p298_p12 = scmp.lt.s32.totalorder %s360_s15, %s360_s15 }
  0x1a   :  { %p294_p11 = scmp.ne.s32.totalorder %s360_s15, %s293_s6  ;;  %p299_p13 = scmp.lt.s32.totalorder %s293_s6, %s293_s6 }
  0x1c   :  { %p300_p0 = por %p299_p13, %p298_p12 }
  0x1e   :  { %p301_p1 = pnand %p300_p0, %p294_p11 }
  0x20   :  { %304 = shalt.err (!%p301_p1)
}
  0x21   :  { %s335_s0 = smov 64   ;;  %s336_s7 = smov 4  }
  0x22   :  { %32 = dma.hbm_to_vmem [thread:$0]  %s407_s1, 1024, %s360_s15, [#allocation6], %s335_s0, %s335_s0, %s336_s7  }
  0x23   :  { %327 = dma.done.wait [#allocation3], 128  }
  0x24   :  { %328 = vsyncadd [#allocation3], 4294967168 }
  0x25   :  { %329 = dma.done.wait [#allocation6], 1024  }
  0x26   :  { %330 = vsyncadd [#allocation6], 4294966272  ;;  %v337_v0 = vmov 0.0   ;;  %vm338_vm0 = vmmov 0   ;;  %v251_v1 = vld [vmem:[#allocation5] sm:$0xff]   ;;  %v252_v2 = vld [vmem:[#allocation5 + $0x8] sm:$0xff]  }
  0x27   :  { %224 = vmatprep.subr.bf16.mxu0 %v337_v0  ;;  %240 = vmatprep.mubr.msk.bf16.mxu0 %vm338_vm0, %v337_v0  ;;  %v253_v3 = vld [vmem:[#allocation5 + $0x10] sm:$0xff]   ;;  %v47_v4 = vld [vmem:[#allocation2] sm:$0xff]  ;;  %v255_v9 = vld [vmem:[#allocation5 + $0x20] sm:$0xff]   ;;  %s339_s11 = smov [#allocation7]  }
  0x28   :  { %225 = vmatpush3.bf16.msra.mxu0 %v251_v1  ;;  %v48_v5 = vmax.f32 %v47_v4, 0.0  ;;  %v254_v6 = vld [vmem:[#allocation5 + $0x18] sm:$0xff]   ;;  %v256_v12 = vld [vmem:[#allocation5 + $0x28] sm:$0xff]   ;;  %v257_v15 = vld [vmem:[#allocation5 + $0x30] sm:$0xff]   ;;  %s196_s12 = sshll.u32 %s339_s11, 4  ;;  %s197_s12 = int_to_ptr.vmem [resolvable:$true] %s196_s12 }
  0x29   :  { %226 = vmatprep.subr.bf16.mxu0 %v337_v0  ;;  %v258_v18 = vld [vmem:[#allocation5 + $0x38] sm:$0xff]   ;;  %s305_s13 = scalar_lea.vmem %s197_s12, 128  ;;  %p310_p3 = scmp.lt.s32.totalorder %s197_s12, %s197_s12 }
  0x2a   :  { %v49_v7 = vrot.slane %v48_v5, 4  ;;  %v214_v32 = vld [vmem:[%s408_s2] ss:$0 sm:$0xff]  ;;  %p306_p2 = scmp.ne.s32.totalorder %s197_s12, %s305_s13  ;;  %p311_p4 = scmp.lt.s32.totalorder %s305_s13, %s305_s13 }
  0x2c   :  { %227 = vmatpush3.bf16.msra.mxu0 %v252_v2  ;;  %v50_v8 = vadd.f32 %v49_v7, %v48_v5  ;;  %p312_p5 = por %p311_p4, %p310_p3 }
  0x2d   :  { %228 = vmatprep.subr.bf16.mxu0 %v337_v0 }
  0x2e   :  { %v51_v10 = vrot.slane %v50_v8, 2  ;;  %p313_p6 = pnand %p312_p5, %p306_p2 }
  0x30   :  { %229 = vmatpush3.bf16.msra.mxu0 %v253_v3  ;;  %v52_v11 = vadd.f32 %v51_v10, %v50_v8 }
  0x31   :  { %230 = vmatprep.subr.bf16.mxu0 %v337_v0 }
  0x32   :  { %v53_v13 = vrot.slane %v52_v11, 1 }
  0x34   :  { %231 = vmatpush3.bf16.msra.mxu0 %v254_v6  ;;  %v54_v14 = vadd.f32 %v53_v13, %v52_v11 }
  0x35   :  { %232 = vmatprep.subr.bf16.mxu0 %v337_v0 }
  0x36   :  { %v56_v16 = vmul.f32 0.125, %v54_v14 }
  0x38   :  { %233 = vmatpush3.bf16.msra.mxu0 %v255_v9  ;;  %v57_v17 = vsub.f32 %v48_v5, %v56_v16 }
  0x39   :  { %234 = vmatprep.subr.bf16.mxu0 %v337_v0 }
  0x3a   :  { %v58_v19 = vmul.f32 %v57_v17, %v57_v17 }
  0x3c   :  { %235 = vmatpush3.bf16.msra.mxu0 %v256_v12  ;;  %v59_v20 = vrot.slane %v58_v19, 4 }
  0x3d   :  { %236 = vmatprep.subr.bf16.mxu0 %v337_v0 }
  0x3e   :  { %v60_v21 = vadd.f32 %v59_v20, %v58_v19 }
  0x40   :  { %237 = vmatpush3.bf16.msra.mxu0 %v257_v15  ;;  %v61_v22 = vrot.slane %v60_v21, 2 }
  0x41   :  { %238 = vmatprep.subr.bf16.mxu0 %v337_v0 }
  0x42   :  { %v62_v23 = vadd.f32 %v61_v22, %v60_v21 }
  0x44   :  { %239 = vmatpush3.bf16.msra.mxu0 %v258_v18  ;;  %v63_v24 = vrot.slane %v62_v23, 1 }
  0x46   :  { %v64_v25 = vadd.f32 %v63_v24, %v62_v23 }
  0x48   :  { %v65_v26 = vmul.f32 0.125, %v64_v25 }
  0x4a   :  { %v66_v27 = vadd.f32 1e-06, %v65_v26 }
  0x4c   :  { %259 = vrsqrt.f32 %v66_v27 }
  0x56   :  { %v260_v28 = vpop.eup %259 }
  0x57   :  { %v68_v29 = vmul.f32 %v260_v28, %v57_v17 }
  0x59   :  { %v70_v30 = vpack.c.bf16 %v68_v29, %v68_v29 }
  0x5b   :  { %241 = vmatmul.mubr.bf16.vlgmr.msra.gmra.mrb[0].mxu0 %v70_v30 }
 0x12e   :  { %v169_v31 = vpop.f32.mrb[0].mxu0 }
 0x12f   :  { %v242_v33 = vpop.f32.mrb[1].mxu0  ;;  %v188_v36 = vadd.f32 %v214_v32, %v169_v31 }
 0x130   :  { %v172_v34 = vpop.f32.mrb[2].mxu0 }
 0x131   :  { %v243_v35 = vpop.f32.mrb[3].mxu0  ;;  %189 = vst [vmem:[#allocation7] sm:$0xff] %v188_v36 }
 0x132   :  { %316 = shalt.err (!%p313_p6)
}
 0x133   :  { %s317_s16 = scalar_lea.hbm %s409_s3, 128 }
 0x134   :  { %p318_p7 = scmp.ne.s32.totalorder %s409_s3, %s317_s16  ;;  %p321_p8 = scmp.lt.u32.totalorder %s317_s16, %s409_s3 }
 0x136   :  { %p323_p9 = pnand %p321_p8, %p318_p7 }
 0x138   :  { %326 = shalt.err (!%p323_p9)
}
 0x139   :  { %199 = dma.vmem_to_hbm [thread:$0]  %s197_s12, 128, %s409_s3, [#allocation4]  }
 0x13a   :  { %331 = dma.done.wait [#allocation4], 128  }
 0x13b   :  { %332 = vsyncadd [#allocation4], 4294967168 }
 0x13c   :  { %203 = vsyncpa [#allocation3], 1 }
 0x13d   :  { %204 = vsyncpa [#allocation6], 1 }
 0x13e   :  { %205 = vsyncpa [#allocation4], 1 }

</bundles_post_ra>
